<compile_context>
chip_gen: v5e
topology: v5e:2x2
jax: 0.10.0
libtpu: 0.0.40
codegen_flags: <defaults>
</compile_context>

<pallas_src>
import functools
import math

import jax
import jax.numpy as jnp
from jax.experimental import pallas as pl
from jax.experimental.pallas import tpu as pltpu


def _round_up(x, m):
    return (x + m - 1) // m * m


def _vmem_limit_bytes(est):
    """Clamp a VMEM-usage estimate into a sane scoped-VMEM request."""
    return int(min(max(est, 32 * 1024 * 1024), 128 * 1024 * 1024))


# ---------------------------------------------------------------------------
# Kernel 1: row-tiled Linear  y = x @ W + b
# (W stored as (in, out), i.e. the transpose of PyTorch's nn.Linear weight.)
# ---------------------------------------------------------------------------
def _linear_kernel(x_ref, w_ref, b_ref, o_ref, *, mxu_dtype):
    x = x_ref[...]
    w = w_ref[...]
    if mxu_dtype is not None:          # bf16 MXU operands on v6e/v7x, f32 accumulation
        x = x.astype(mxu_dtype)
        w = w.astype(mxu_dtype)
    acc = jnp.dot(x, w, preferred_element_type=jnp.float32)
    o_ref[...] = (acc + b_ref[...].astype(jnp.float32)).astype(o_ref.dtype)


def linear_pallas(x2d, w, b, *, tm=512, mxu_dtype=None):
    """x2d: (M, d_in); w: (d_in, d_out); b: (d_out,)  ->  (M, d_out)."""
    M, d_in = x2d.shape
    d_out = w.shape[1]
    # Big row tiles keep the MXU fed and amortise the ~0.35us/step grid overhead;
    # pad the token count instead of asserting divisibility.
    tm = min(tm, _round_up(M, 8))
    Mp = _round_up(M, tm)
    if Mp != M:
        x2d = jnp.pad(x2d, ((0, Mp - M), (0, 0)))

    isz = jnp.dtype(x2d.dtype).itemsize
    est = (2 * tm * (d_in + d_out) * isz        # double-buffered activation/out blocks
           + (d_in + 1) * d_out * isz           # resident weight + bias
           + 2 * tm * d_out * 4)                # f32 accumulator / cast temporaries

    out = pl.pallas_call(
        functools.partial(_linear_kernel, mxu_dtype=mxu_dtype),
        out_shape=jax.ShapeDtypeStruct((Mp, d_out), x2d.dtype),
        grid_spec=pltpu.PrefetchScalarGridSpec(
            num_scalar_prefetch=0,
            grid=(Mp // tm,),
            in_specs=[
                pl.BlockSpec((tm, d_in), lambda i: (i, 0)),      # activations (streamed)
                pl.BlockSpec((d_in, d_out), lambda i: (0, 0)),   # weight (VMEM-resident)
                pl.BlockSpec((1, d_out), lambda i: (0, 0)),      # bias  (VMEM-resident)
            ],
            out_specs=pl.BlockSpec((tm, d_out), lambda i: (i, 0)),
        ),
        compiler_params=pltpu.CompilerParams(
            dimension_semantics=("parallel",),          # megacore-shardable token axis
            vmem_limit_bytes=_vmem_limit_bytes(est),
        ),
    )(x2d, w, b.reshape(1, d_out))
    # TODO(synk): for very large embed dims, add a reduction grid axis over d_in and a
    # VMEM accumulator so the weights are streamed instead of held resident.
    return out[:M]


# ---------------------------------------------------------------------------
# Kernel 2: per-(batch, q-tile) attention with in-kernel head loop, fused head
# compressor and fused output projection.  q/k/v arrive in (·, S, E) layout.
# ---------------------------------------------------------------------------
def _attention_kernel(*refs, num_heads, head_dim, scale, with_mask, mxu_dtype):
    if with_mask:
        (q_ref, k_ref, v_ref, mask_ref, wo_ref, bo_ref, wc_ref, bc_ref,
         out_ref, attnc_ref, ctx_ref) = refs
    else:
        (q_ref, k_ref, v_ref, wo_ref, bo_ref, wc_ref, bc_ref,
         out_ref, attnc_ref, ctx_ref) = refs
        mask_ref = None

    cdt = mxu_dtype if mxu_dtype is not None else q_ref.dtype
    q = q_ref[0]                                  # (tq, E)  lane-dense load
    k = k_ref[0]                                  # (Sk, E)
    v = v_ref[0]                                  # (Sk, E)
    addmask = mask_ref[0] if with_mask else None  # (tq, Sk) additive f32 (0 / -1e30)

    attnc = None
    for h in range(num_heads):                    # small static unroll over heads
        lo = h * head_dim
        hi = lo + head_dim
        # Fold 1/sqrt(Dh) into q: scales Dh lanes instead of Sk lanes.
        qh = (q[:, lo:hi] * scale).astype(cdt)
        kh = k[:, lo:hi].astype(cdt)
        vh = v[:, lo:hi].astype(cdt)

        # scores = q_h @ k_h^T, f32 accumulation on the MXU.
        s = jax.lax.dot_general(
            qh, kh, dimension_numbers=(((1,), (1,)), ((), ())),
            preferred_element_type=jnp.float32)
        if with_mask:
            s = s + addmask                       # additive mask: no -inf NaN rows

        s_max = jnp.max(s, axis=-1, keepdims=True)
        p = jnp.exp(s - s_max)
        p_attn = p * pl.reciprocal(jnp.sum(p, axis=-1, keepdims=True), approx=True)
        # Dropout on p_attn: eval-mode identity.
        # TODO(synk): training-mode dropout via pltpu.prng_seed / prng_random_bits.

        # Merge-heads fused: write this head's context into the lane slot h*Dh of a
        # lane-dense (tq, E) f32 slab.
        ctx_ref[:, lo:hi] = jnp.dot(p_attn.astype(cdt), vh,
                                    preferred_element_type=jnp.float32)

        # Compressor Linear(H, 1) fused: attn_c = sum_h wc[h] * p_attn + bc.
        contrib = p_attn * wc_ref[h]
        attnc = contrib if attnc is None else attnc + contrib

    attnc_ref[0, 0] = (attnc + bc_ref[0]).astype(attnc_ref.dtype)

    # Fused output projection (Linear_3): (tq, E) @ (E, E) + b, stored lane-dense once.
    y = jnp.dot(ctx_ref[...].astype(cdt), wo_ref[...].astype(cdt),
                preferred_element_type=jnp.float32)
    out_ref[0] = (y + bo_ref[...].astype(jnp.float32)).astype(out_ref.dtype)


def multi_head_attention(query, key, value, params, *, num_heads, mask=None,
                         mxu_dtype=None):
    """Pallas forward of MultiHeadAttention (eval mode, compress_attention=True).

    query/key/value: (B, S, E).  Returns (out (B, Sq, E), attn (B, 1, Sq, Sk)).
    mxu_dtype=jnp.bfloat16 casts MXU operands to bf16 (f32 accumulation) for v6e/v7x.
    """
    (wq, bq, wk, bk, wv, bv, wo, bo, wc, bc) = params
    B, Sq, E = query.shape
    Sk = key.shape[1]
    assert E % num_heads == 0, "embed_dim must be a multiple of num_heads"
    Dh = E // num_heads
    scale = 1.0 / math.sqrt(Dh)

    # ---- projections: fuse Q/K/V into as few matmuls as possible --------------------
    # (identity checks resolve at trace time; same object => shared activations)
    if (query is key) and (key is value):
        w_qkv = jnp.concatenate([wq, wk, wv], axis=1)          # (E, 3E)
        b_qkv = jnp.concatenate([bq, bk, bv])
        qkv = linear_pallas(query.reshape(B * Sq, E), w_qkv, b_qkv,
                            mxu_dtype=mxu_dtype).reshape(B, Sq, 3 * E)
        q_src = k_src = v_src = qkv
        q_blk, k_blk, v_blk = 0, 1, 2
    elif key is value:
        q_src = linear_pallas(query.reshape(B * Sq, E), wq, bq,
                              mxu_dtype=mxu_dtype).reshape(B, Sq, E)
        w_kv = jnp.concatenate([wk, wv], axis=1)               # (E, 2E)
        b_kv = jnp.concatenate([bk, bv])
        kv_proj = linear_pallas(key.reshape(B * Sk, E), w_kv, b_kv,
                                mxu_dtype=mxu_dtype).reshape(B, Sk, 2 * E)
        k_src = v_src = kv_proj
        q_blk, k_blk, v_blk = 0, 0, 1
    else:
        q_src = linear_pallas(query.reshape(B * Sq, E), wq, bq,
                              mxu_dtype=mxu_dtype).reshape(B, Sq, E)
        k_src = linear_pallas(key.reshape(B * Sk, E), wk, bk,
                              mxu_dtype=mxu_dtype).reshape(B, Sk, E)
        v_src = linear_pallas(value.reshape(B * Sk, E), wv, bv,
                              mxu_dtype=mxu_dtype).reshape(B, Sk, E)
        q_blk = k_blk = v_blk = 0
    # q/k/v stay in (B, S, E) / (B, S, k*E) layout: no head-split transpose; heads are
    # selected by the lane-block index of the BlockSpec + static lane slices in-kernel.

    # ---- query tiling: also gives v7x's 2nd TensorCore a parallel axis ---------------
    tq = Sq
    for cand in (512, 256, 128):
        if Sq % cand == 0:
            tq = cand
            break
    # TODO(synk): for very long Sk, tile Sk flash-style (online softmax + attn-tile
    # rescale) so the (tq, Sk) working set fits v7x's 64 MiB VMEM.

    with_mask = mask is not None
    inputs = [q_src, k_src, v_src]
    in_specs = [
        pl.BlockSpec((1, tq, E), lambda b, i, blk=q_blk: (b, i, blk)),
        pl.BlockSpec((1, Sk, E), lambda b, i, blk=k_blk: (b, 0, blk)),
        pl.BlockSpec((1, Sk, E), lambda b, i, blk=v_blk: (b, 0, blk)),
    ]
    if with_mask:
        m = jnp.asarray(mask)
        if m.ndim == 2:
            m = m[None]
        mB = m.shape[0]
        m = jnp.broadcast_to(m, (mB, Sq, Sk))
        addmask = jnp.where(m == 0, jnp.float32(-1e30), jnp.float32(0.0))
        inputs.append(addmask)
        in_specs.append(
            pl.BlockSpec((1, tq, Sk),
                         lambda b, i, per_batch=(mB > 1): (b if per_batch else 0, i, 0)))
        # TODO(synk): for causal masks, build the additive mask in-kernel with
        # broadcasted_iota and skip this DMA entirely.
    # Output-projection weights live VMEM-resident; compressor params live in SMEM.
    inputs += [wo, bo.reshape(1, E), wc, bc]
    in_specs += [
        pl.BlockSpec((E, E), lambda b, i: (0, 0)),
        pl.BlockSpec((1, E), lambda b, i: (0, 0)),
        pl.BlockSpec(memory_space=pltpu.MemorySpace.SMEM),
        pl.BlockSpec(memory_space=pltpu.MemorySpace.SMEM),
    ]

    isz = jnp.dtype(query.dtype).itemsize
    est = (2 * (tq + 2 * Sk) * E * isz        # q/k/v blocks (double-buffered)
           + 2 * tq * Sk * 4                  # additive mask block
           + (E + 1) * E * isz                # resident wo + bo
           + 2 * (tq * E + tq * Sk) * isz     # out / attn blocks
           + tq * E * 4                       # ctx scratch slab
           + 6 * tq * Sk * 4)                 # softmax / compressor f32 temporaries

    out, attn_c = pl.pallas_call(
        functools.partial(_attention_kernel, num_heads=num_heads, head_dim=Dh,
                          scale=scale, with_mask=with_mask, mxu_dtype=mxu_dtype),
        out_shape=(
            jax.ShapeDtypeStruct((B, Sq, E), query.dtype),
            jax.ShapeDtypeStruct((B, 1, Sq, Sk), query.dtype),
        ),
        grid_spec=pltpu.PrefetchScalarGridSpec(
            num_scalar_prefetch=0,
            grid=(B, Sq // tq),
            in_specs=in_specs,
            out_specs=[
                pl.BlockSpec((1, tq, E), lambda b, i: (b, i, 0)),       # lane-dense out
                pl.BlockSpec((1, 1, tq, Sk), lambda b, i: (b, 0, i, 0)),
            ],
            scratch_shapes=[pltpu.VMEM((tq, E), jnp.float32)],          # ctx slab
        ),
        compiler_params=pltpu.CompilerParams(
            dimension_semantics=("parallel", "parallel"),
            vmem_limit_bytes=_vmem_limit_bytes(est),
        ),
    )(*inputs)
    # TODO(synk): compress_attention=False would output the raw (B, H, Sq, Sk) p_attn.
    return out, attn_c


# ---------------------------------------------------------------------------
# Parameter init (mimics nn.Linear default uniform(+/- 1/sqrt(fan_in))) + reference.
# ---------------------------------------------------------------------------
def init_params(key, embed_dim, num_heads, dtype=jnp.float32):
    ks = jax.random.split(key, 10)
    bound = 1.0 / math.sqrt(embed_dim)

    def linear_init(kw, kb):
        w = jax.random.uniform(kw, (embed_dim, embed_dim), dtype, -bound, bound)
        b_ = jax.random.uniform(kb, (embed_dim,), dtype, -bound, bound)
        return w, b_

    wq, bq = linear_init(ks[0], ks[1])
    wk, bk = linear_init(ks[2], ks[3])
    wv, bv = linear_init(ks[4], ks[5])
    wo, bo = linear_init(ks[6], ks[7])
    cb = 1.0 / math.sqrt(num_heads)
    wc = jax.random.uniform(ks[8], (num_heads,), dtype, -cb, cb)
    bc = jax.random.uniform(ks[9], (1,), dtype, -cb, cb)
    return (wq, bq, wk, bk, wv, bv, wo, bo, wc, bc)


def reference_mha(query, key, value, params, num_heads, mask=None):
    (wq, bq, wk, bk, wv, bv, wo, bo, wc, bc) = params
    B, Sq, E = query.shape
    Sk = key.shape[1]
    Dh = E // num_heads

    def project(x, w, b, S):
        return (x @ w + b).reshape(B, S, num_heads, Dh).transpose(0, 2, 1, 3)

    q = project(query, wq, bq, Sq)
    k = project(key, wk, bk, Sk)
    v = project(value, wv, bv, Sk)
    scores = jnp.einsum("bhqd,bhkd->bhqk", q, k) / math.sqrt(Dh)
    if mask is not None:
        m = jnp.broadcast_to(jnp.asarray(mask, jnp.int32), (B, Sq, Sk))
        scores = jnp.where(m[:, None] == 0, -jnp.inf, scores)
    p = jax.nn.softmax(scores, axis=-1)
    ctx = jnp.einsum("bhqk,bhkd->bhqd", p, v)
    x = ctx.transpose(0, 2, 1, 3).reshape(B, Sq, E)
    out = x @ wo + bo
    attn_c = jnp.einsum("bhqk,h->bqk", p, wc)[:, None, :, :] + bc[0]
    return out, attn_c


if __name__ == "__main__":
    # Small but lane-dense shapes: E and S are multiples of 128, head_dim = 32.
    B, S, E, H = 2, 128, 128, 4
    root = jax.random.PRNGKey(0)
    kx, kkv, kp = jax.random.split(root, 3)
    x = jax.random.normal(kx, (B, S, E), jnp.float32)
    kv = jax.random.normal(kkv, (B, S, E), jnp.float32)
    params = init_params(kp, E, H)

    # 1) self-attention (fully fused QKV projection), no mask, f32 MXU
    out, attn = jax.block_until_ready(
        multi_head_attention(x, x, x, params, num_heads=H))
    ref_out, ref_attn = reference_mha(x, x, x, params, H)
    assert out.shape == (B, S, E) and attn.shape == (B, 1, S, S)
    assert jnp.allclose(out, ref_out, atol=2e-3, rtol=2e-3), "output mismatch (self)"
    assert jnp.allclose(attn, ref_attn, atol=2e-3, rtol=2e-3), "attn mismatch (self)"

    # 2) cross-attention (fused KV projection) with a causal mask
    mask = jnp.tril(jnp.ones((S, S), jnp.int32))
    out_m, attn_m = jax.block_until_ready(
        multi_head_attention(x, kv, kv, params, num_heads=H, mask=mask))
    ref_out_m, ref_attn_m = reference_mha(x, kv, kv, params, H, mask=mask)
    assert jnp.allclose(out_m, ref_out_m, atol=2e-3, rtol=2e-3), "output mismatch (mask)"
    assert jnp.allclose(attn_m, ref_attn_m, atol=2e-3, rtol=2e-3), "attn mismatch (mask)"

    # 3) bf16 MXU operands (v6e/v7x fast path), f32 accumulation, looser tolerance
    out_b, attn_b = jax.block_until_ready(
        multi_head_attention(x, x, x, params, num_heads=H, mxu_dtype=jnp.bfloat16))
    assert jnp.allclose(out_b, ref_out, atol=5e-2, rtol=5e-2), "output mismatch (bf16)"
    assert jnp.allclose(attn_b, ref_attn, atol=5e-2, rtol=5e-2), "attn mismatch (bf16)"

    print("KERNEL_OK")
</pallas_src>

<mosaic_0001>
module attributes {stable_mosaic.version = 11 : i64} {
  func.func @_linear_kernel(%arg0: i32, %arg1: memref<256x128xf32, #tpu.memory_space<vmem>>, %arg2: memref<128x384xf32, #tpu.memory_space<vmem>>, %arg3: memref<1x384xf32, #tpu.memory_space<vmem>>, %arg4: memref<256x384xf32, #tpu.memory_space<vmem>>) attributes {dimension_semantics = [#tpu.dimension_semantics<parallel>], iteration_bounds = array<i64: 1>, scalar_prefetch = 0 : i64, scratch_operands = 0 : i64, tpu.core_type = #tpu.core_type<tc>, window_params = [{transform_indices = @transform_0, window_bounds = array<i64: 256, 128>}, {pipeline_mode = #tpu.pipeline_mode<synchronous>, transform_indices = @transform_1, window_bounds = array<i64: 128, 384>}, {pipeline_mode = #tpu.pipeline_mode<synchronous>, transform_indices = @transform_2, window_bounds = array<i64: 1, 384>}, {transform_indices = @transform_3, window_bounds = array<i64: 256, 384>}]} {
    %c0 = arith.constant 0 : index
    %c0_0 = arith.constant 0 : index
    %0 = vector.load %arg1[%c0, %c0_0] : memref<256x128xf32, #tpu.memory_space<vmem>>, vector<256x128xf32>
    %c0_1 = arith.constant 0 : index
    %c0_2 = arith.constant 0 : index
    %1 = vector.load %arg2[%c0_1, %c0_2] : memref<128x384xf32, #tpu.memory_space<vmem>>, vector<128x384xf32>
    %cst = arith.constant dense<0.000000e+00> : vector<256x384xf32>
    %2 = tpu.matmul %0, %1, %cst {dimension_numbers = #tpu.dot_dimension_numbers<[1], [0], [0], [1], [0, 0, 1, 1], [], []>} : vector<256x128xf32>, vector<128x384xf32>, vector<256x384xf32> -> vector<256x384xf32>
    %c0_3 = arith.constant 0 : index
    %c0_4 = arith.constant 0 : index
    %3 = vector.load %arg3[%c0_3, %c0_4] : memref<1x384xf32, #tpu.memory_space<vmem>>, vector<1x384xf32>
    %4 = vector.broadcast %3 : vector<1x384xf32> to vector<256x384xf32>
    %5 = arith.addf %2, %4 : vector<256x384xf32>
    %c0_5 = arith.constant 0 : index
    %c0_6 = arith.constant 0 : index
    %6 = vector.load %arg4[%c0_5, %c0_6] : memref<256x384xf32, #tpu.memory_space<vmem>>, vector<256x384xf32>
    tpu.vector_store %arg4[%c0_5, %c0_6], %5 {strides = array<i32>} : memref<256x384xf32, #tpu.memory_space<vmem>>, vector<256x384xf32>,
    return
  }
  func.func @transform_0(%arg0: i32) -> (i32, i32) {
    %c0_i32 = arith.constant 0 : i32
    %c0_i32_0 = arith.constant 0 : i32
    return %arg0, %c0_i32 : i32, i32
  }
  func.func @transform_1(%arg0: i32) -> (i32, i32) {
    %c0_i32 = arith.constant 0 : i32
    %c0_i32_0 = arith.constant 0 : i32
    %c0_i32_1 = arith.constant 0 : i32
    return %c0_i32, %c0_i32_0 : i32, i32
  }
  func.func @transform_2(%arg0: i32) -> (i32, i32) {
    %c0_i32 = arith.constant 0 : i32
    %c0_i32_0 = arith.constant 0 : i32
    %c0_i32_1 = arith.constant 0 : i32
    return %c0_i32, %c0_i32_0 : i32, i32
  }
  func.func @transform_3(%arg0: i32) -> (i32, i32) {
    %c0_i32 = arith.constant 0 : i32
    %c0_i32_0 = arith.constant 0 : i32
    return %arg0, %c0_i32 : i32, i32
  }
}

</mosaic_0001>

<bundles_post_ra>
// kernel: tpu_custom_call.1
= control target key start
LH: loop header
LB: loop body
LE: loop exit
PB: predicated region body
PF: predicated region fallthrough
CT: control target
= control target key end

     0   :  { %8 = vsyncpa [#allocation3], 0  ;;  %s1057_s0 = inlined_call_operand.hbm [shape: f32[256,128], index: 0, kind: input, shape index: {}]   ;;  %s1058_s1 = inlined_call_operand.hbm [shape: f32[128,384], index: 1, kind: input, shape index: {}]   ;;  %s1059_s2 = inlined_call_operand.hbm [shape: f32[1,384], index: 2, kind: input, shape index: {}]   ;;  %s1060_s3 = inlined_call_operand.hbm [shape: f32[256,384], index: 3, kind: output, shape index: {}]  }
   0x1   :  { %9 = vsyncpa [#allocation6], 0  ;;  %s28_s14 = sshll.u32 %s1058_s1, 4  ;;  %s29_s14 = int_to_ptr.hbm [resolvable:$true] %s28_s14 }
   0x2   :  { %10 = vsyncpa [#allocation4], 0  ;;  %s761_s15 = smov [#allocation5]   ;;  %s15_s19 = sshll.u32 %s1057_s0, 4  ;;  %s16_s19 = int_to_ptr.hbm [resolvable:$true] %s15_s19 }
   0x3   :  { %s30_s16 = sshll.u32 %s761_s15, 4  ;;  %s762_s20 = smov 384   ;;  %s31_s16 = int_to_ptr.vmem [resolvable:$true] %s30_s16 }
   0x4   :  { %s763_s21 = smov 24   ;;  %s764_s22 = smov [#allocation2]  }
   0x5   :  { %36 = dma.hbm_to_vmem [thread:$0]  %s29_s14, 6144, %s31_s16, [#allocation6], %s762_s20, %s762_s20, %s763_s21  }
   0x6   :  { %s17_s23 = sshll.u32 %s764_s22, 4  ;;  %s765_s1 = smov 128   ;;  %s18_s23 = int_to_ptr.vmem [resolvable:$true] %s17_s23 }
   0x7   :  { %s766_s24 = smov 8   ;;  %s42_s27 = sshll.u32 %s1059_s2, 4  ;;  %s43_s27 = int_to_ptr.hbm [resolvable:$true] %s42_s27 }
   0x8   :  { %23 = dma.hbm_to_vmem [thread:$0]  %s16_s19, 4096, %s18_s23, [#allocation3], %s765_s1, %s765_s1, %s766_s24  }
   0x9   :  { %s767_s28 = smov [#allocation7]  }
   0xa   :  { %s44_s0 = sshll.u32 %s767_s28, 4  ;;  %s45_s0 = int_to_ptr.vmem [resolvable:$true] %s44_s0 }
   0xb   :  { %47 = dma.hbm_to_vmem [thread:$0]  %s43_s27, 48, %s45_s0, [#allocation6]  }
   0xc   :  { %755 = dma.done.wait [#allocation3], 4096  }
   0xd   :  { %756 = vsyncadd [#allocation3], 4294963200 }
   0xe   :  { %757 = dma.done.wait [#allocation6], 6192  }
   0xf   :  { %758 = vsyncadd [#allocation6], 4294961104  ;;  %v137_v0 = vld [vmem:[#allocation5 + $0x168] sm:$0xff]  ;;  %v801_v1 = vld [vmem:[#allocation5 + $0x178] sm:$0xff]  ;;  %s768_s2 = smov [#allocation8]   ;;  %s589_s5 = sshll.u32 %s1060_s3, 4  ;;  %s590_s5 = int_to_ptr.hbm [resolvable:$true] %s589_s5 }
  0x10   :  { %v134_v2 = vld [vmem:[#allocation5 + $0x150] sm:$0xff]  ;;  %603 = vmatpush.msra.mxu3 %v137_v0  ;;  %374 = vmatpush.msra.mxu2 %v801_v1  ;;  %v804_v3 = vld [vmem:[#allocation5 + $0x160] sm:$0xff]  ;;  %v131_v4 = vld [vmem:[#allocation5 + $0x138] sm:$0xff]  ;;  %s587_s29 = sshll.u32 %s768_s2, 4  ;;  %s588_s29 = int_to_ptr.vmem [resolvable:$true] %s587_s29 }
  0x11   :  { %v806_v5 = vld [vmem:[#allocation5 + $0x148] sm:$0xff]  ;;  %148 = vmatpush.msra.mxu0 %v137_v0  ;;  %v808_v6 = vld [vmem:[#allocation5 + $0x170] sm:$0xff]  ;;  %v811_v7 = vld [vmem:[#allocation5 + $0x158] sm:$0xff] }
  0x12   :  { %604 = vmatpush.msra.mxu3 %v134_v2  ;;  %375 = vmatpush.msra.mxu2 %v804_v3  ;;  %v128_v8 = vld [vmem:[#allocation5 + $0x120] sm:$0xff]  ;;  %v814_v9 = vld [vmem:[#allocation5 + $0x130] sm:$0xff]  ;;  %v125_v11 = vld [vmem:[#allocation5 + $0x108] sm:$0xff] }
  0x13   :  { %261 = vmatpush.msra.mxu1 %v808_v6  ;;  %149 = vmatpush.msra.mxu0 %v134_v2  ;;  %v817_v10 = vld [vmem:[#allocation5 + $0x140] sm:$0xff]  ;;  %v820_v12 = vld [vmem:[#allocation5 + $0x118] sm:$0xff]  ;;  %v823_v13 = vld [vmem:[#allocation5 + $0x128] sm:$0xff] }
  0x14   :  { %605 = vmatpush.msra.mxu3 %v131_v4  ;;  %376 = vmatpush.msra.mxu2 %v806_v5  ;;  %v122_v14 = vld [vmem:[#allocation5 + $0xf0] sm:$0xff]  ;;  %v826_v15 = vld [vmem:[#allocation5 + $0x100] sm:$0xff]  ;;  %v119_v17 = vld [vmem:[#allocation5 + $0xd8] sm:$0xff] }
  0x15   :  { %262 = vmatpush.msra.mxu1 %v811_v7  ;;  %150 = vmatpush.msra.mxu0 %v131_v4  ;;  %v829_v16 = vld [vmem:[#allocation5 + $0x110] sm:$0xff]  ;;  %v832_v18 = vld [vmem:[#allocation5 + $0xe8] sm:$0xff]  ;;  %v835_v19 = vld [vmem:[#allocation5 + $0xf8] sm:$0xff] }
  0x16   :  { %606 = vmatpush.msra.mxu3 %v128_v8  ;;  %377 = vmatpush.msra.mxu2 %v814_v9  ;;  %v116_v20 = vld [vmem:[#allocation5 + $0xc0] sm:$0xff]  ;;  %v838_v21 = vld [vmem:[#allocation5 + $0xd0] sm:$0xff]  ;;  %v113_v23 = vld [vmem:[#allocation5 + $0xa8] sm:$0xff] }
  0x17   :  { %263 = vmatpush.msra.mxu1 %v817_v10  ;;  %151 = vmatpush.msra.mxu0 %v128_v8  ;;  %v841_v22 = vld [vmem:[#allocation5 + $0xe0] sm:$0xff]  ;;  %v844_v24 = vld [vmem:[#allocation5 + $0xb8] sm:$0xff]  ;;  %v847_v25 = vld [vmem:[#allocation5 + $0xc8] sm:$0xff] }
  0x18   :  { %607 = vmatpush.msra.mxu3 %v125_v11  ;;  %378 = vmatpush.msra.mxu2 %v820_v12  ;;  %v110_v26 = vld [vmem:[#allocation5 + $0x90] sm:$0xff]  ;;  %v850_v27 = vld [vmem:[#allocation5 + $0xa0] sm:$0xff]  ;;  %v107_v29 = vld [vmem:[#allocation5 + $0x78] sm:$0xff] }
  0x19   :  { %264 = vmatpush.msra.mxu1 %v823_v13  ;;  %152 = vmatpush.msra.mxu0 %v125_v11  ;;  %v853_v28 = vld [vmem:[#allocation5 + $0xb0] sm:$0xff]  ;;  %v856_v30 = vld [vmem:[#allocation5 + $0x88] sm:$0xff]  ;;  %v859_v31 = vld [vmem:[#allocation5 + $0x98] sm:$0xff] }
  0x1a   :  { %608 = vmatpush.msra.mxu3 %v122_v14  ;;  %379 = vmatpush.msra.mxu2 %v826_v15  ;;  %v104_v32 = vld [vmem:[#allocation5 + $0x60] sm:$0xff]  ;;  %v862_v33 = vld [vmem:[#allocation5 + $0x70] sm:$0xff]  ;;  %v101_v35 = vld [vmem:[#allocation5 + $0x48] sm:$0xff] }
  0x1b   :  { %265 = vmatpush.msra.mxu1 %v829_v16  ;;  %153 = vmatpush.msra.mxu0 %v122_v14  ;;  %v865_v34 = vld [vmem:[#allocation5 + $0x80] sm:$0xff]  ;;  %v868_v36 = vld [vmem:[#allocation5 + $0x58] sm:$0xff]  ;;  %v105_v37 = vld [vmem:[#allocation5 + $0x68] sm:$0xff] }
  0x1c   :  { %609 = vmatpush.msra.mxu3 %v119_v17  ;;  %380 = vmatpush.msra.mxu2 %v832_v18  ;;  %v98_v38 = vld [vmem:[#allocation5 + $0x30] sm:$0xff]  ;;  %v872_v39 = vld [vmem:[#allocation5 + $0x40] sm:$0xff]  ;;  %v95_v41 = vld [vmem:[#allocation5 + $0x18] sm:$0xff] }
  0x1d   :  { %266 = vmatpush.msra.mxu1 %v835_v19  ;;  %154 = vmatpush.msra.mxu0 %v119_v17  ;;  %v102_v40 = vld [vmem:[#allocation5 + $0x50] sm:$0xff]  ;;  %v875_v42 = vld [vmem:[#allocation5 + $0x28] sm:$0xff]  ;;  %v99_v43 = vld [vmem:[#allocation5 + $0x38] sm:$0xff] }
  0x1e   :  { %610 = vmatpush.msra.mxu3 %v116_v20  ;;  %381 = vmatpush.msra.mxu2 %v838_v21  ;;  %v92_v44 = vld [vmem:[#allocation5] sm:$0xff]  ;;  %v878_v45 = vld [vmem:[#allocation5 + $0x10] sm:$0xff]  ;;  %v93_v49 = vld [vmem:[#allocation5 + $0x8] sm:$0xff] }
  0x1f   :  { %267 = vmatpush.msra.mxu1 %v841_v22  ;;  %155 = vmatpush.msra.mxu0 %v116_v20  ;;  %v881_v46 = vld [vmem:[#allocation2 + $0xc0] sm:$0xff]  ;;  %v887_v50 = vld [vmem:[#allocation2 + $0xc8] sm:$0xff]  ;;  %v894_v52 = vld [vmem:[#allocation2 + $0xd0] sm:$0xff] }
  0x20   :  { %611 = vmatpush.msra.mxu3 %v113_v23  ;;  %382 = vmatpush.msra.mxu2 %v844_v24  ;;  %v60_v47 = vld [vmem:[#allocation2] sm:$0xff]  ;;  %v61_v51 = vld [vmem:[#allocation2 + $0x8] sm:$0xff]  ;;  %v62_v53 = vld [vmem:[#allocation2 + $0x10] sm:$0xff] }
  0x21   :  { %268 = vmatpush.msra.mxu1 %v847_v25  ;;  %156 = vmatpush.msra.mxu0 %v113_v23  ;;  %v96_v48 = vld [vmem:[#allocation5 + $0x20] sm:$0xff]  ;;  %v901_v54 = vld [vmem:[#allocation2 + $0xd8] sm:$0xff]  ;;  %v910_v58 = vld [vmem:[#allocation2 + $0xe8] sm:$0xff] }
  0x22   :  { %612 = vmatpush.msra.mxu3 %v110_v26  ;;  %383 = vmatpush.msra.mxu2 %v850_v27  ;;  %v63_v55 = vld [vmem:[#allocation2 + $0x18] sm:$0xff]  ;;  %v905_v56 = vld [vmem:[#allocation2 + $0xe0] sm:$0xff]  ;;  %v65_v59 = vld [vmem:[#allocation2 + $0x28] sm:$0xff] }
  0x23   :  { %269 = vmatpush.msra.mxu1 %v853_v28  ;;  %157 = vmatpush.msra.mxu0 %v110_v26  ;;  %v64_v57 = vld [vmem:[#allocation2 + $0x20] sm:$0xff]  ;;  %v917_v60 = vld [vmem:[#allocation2 + $0xf0] sm:$0xff]  ;;  %v924_v62 = vld [vmem:[#allocation2 + $0xf8] sm:$0xff] }
  0x24   :  { %613 = vmatpush.msra.mxu3 %v107_v29  ;;  %384 = vmatpush.msra.mxu2 %v856_v30  ;;  %v66_v61 = vld [vmem:[#allocation2 + $0x30] sm:$0xff]  ;;  %v67_v63 = vld [vmem:[#allocation2 + $0x38] sm:$0xff]  ;;  %v68_v0 = vld [vmem:[#allocation2 + $0x40] sm:$0xff] }
  0x25   :  { %270 = vmatpush.msra.mxu1 %v859_v31  ;;  %158 = vmatpush.msra.mxu0 %v107_v29  ;;  %v70_v2 = vld [vmem:[#allocation2 + $0x50] sm:$0xff]  ;;  %v72_v4 = vld [vmem:[#allocation2 + $0x60] sm:$0xff] }
  0x26   :  { %614 = vmatpush.msra.mxu3 %v104_v32  ;;  %385 = vmatpush.msra.mxu2 %v862_v33  ;;  %v140_v8 = vld [vmem:[#allocation7] sm:$0x7] }
  0x27   :  { %271 = vmatpush.msra.mxu1 %v865_v34  ;;  %159 = vmatpush.msra.mxu0 %v104_v32  ;;  %v943_v11 = vperm.slane %v140_v8, 1 }
  0x28   :  { %615 = vmatpush.msra.mxu3 %v101_v35  ;;  %386 = vmatpush.msra.mxu2 %v868_v36 }
  0x29   :  { %272 = vmatpush.msra.mxu1 %v105_v37  ;;  %160 = vmatpush.msra.mxu0 %v101_v35 }
  0x2a   :  { %616 = vmatpush.msra.mxu3 %v98_v38  ;;  %387 = vmatpush.msra.mxu2 %v872_v39 }
  0x2b   :  { %273 = vmatpush.msra.mxu1 %v102_v40  ;;  %161 = vmatpush.msra.mxu0 %v98_v38 }
  0x2c   :  { %617 = vmatpush.msra.mxu3 %v95_v41  ;;  %388 = vmatpush.msra.mxu2 %v875_v42 }
  0x2d   :  { %274 = vmatpush.msra.mxu1 %v99_v43  ;;  %162 = vmatpush.msra.mxu0 %v95_v41 }
  0x2e   :  { %618 = vmatpush.msra.mxu3 %v92_v44  ;;  %389 = vmatpush.msra.mxu2 %v878_v45 }
  0x2f   :  { %236 = vmatmul.f32.vlgmr.msra.gmra.mxu3 %v881_v46  ;;  %390 = vmatmul.f32.vlgmr.msra.gmra.mxu2 %v60_v47 }
  0x30   :  { %619 = vmatpush.msrb.mxu3 %v808_v6  ;;  %275 = vmatpush.msra.mxu1 %v96_v48  ;;  %v74_v6 = vld [vmem:[#allocation2 + $0x70] sm:$0xff] }
  0x31   :  { %163 = vmatpush.msra.mxu0 %v92_v44 }
  0x32   :  { %620 = vmatpush.msrb.mxu3 %v811_v7  ;;  %276 = vmatpush.msra.mxu1 %v93_v49  ;;  %v75_v7 = vld [vmem:[#allocation2 + $0x78] sm:$0xff] }
  0x33   :  { %164 = vmatmul.f32.vlgmr.msra.gmra.mxu0 %v60_v47  ;;  %277 = vmatmul.f32.vlgmr.msra.gmra.mxu1 %v60_v47 }
  0x34   :  { %621 = vmatpush.msrb.mxu3 %v817_v10  ;;  %v941_v10 = vperm.slane %v140_v8, 0 }
  0x36   :  { %622 = vmatpush.msrb.mxu3 %v823_v13 }
  0x37   :  { %239 = vmatmul.f32.gmra.mxu3 %v887_v50  ;;  %393 = vmatmul.f32.gmra.mxu2 %v61_v51 }
  0x38   :  { %623 = vmatpush.msrb.mxu3 %v829_v16 }
  0x3a   :  { %624 = vmatpush.msrb.mxu3 %v835_v19 }
  0x3b   :  { %167 = vmatmul.f32.gmra.mxu0 %v61_v51  ;;  %280 = vmatmul.f32.gmra.mxu1 %v61_v51 }
  0x3c   :  { %625 = vmatpush.msrb.mxu3 %v841_v22 }
  0x3e   :  { %626 = vmatpush.msrb.mxu3 %v847_v25 }
  0x3f   :  { %242 = vmatmul.f32.gmra.mxu3 %v894_v52  ;;  %396 = vmatmul.f32.gmra.mxu2 %v62_v53 }
  0x40   :  { %627 = vmatpush.msrb.mxu3 %v853_v28 }
  0x42   :  { %628 = vmatpush.msrb.mxu3 %v859_v31 }
  0x43   :  { %170 = vmatmul.f32.gmra.mxu0 %v62_v53  ;;  %283 = vmatmul.f32.gmra.mxu1 %v62_v53 }
  0x44   :  { %629 = vmatpush.msrb.mxu3 %v865_v34 }
  0x46   :  { %630 = vmatpush.msrb.mxu3 %v105_v37 }
  0x47   :  { %245 = vmatmul.f32.gmra.mxu3 %v901_v54  ;;  %399 = vmatmul.f32.gmra.mxu2 %v63_v55 }
  0x48   :  { %631 = vmatpush.msrb.mxu3 %v102_v40 }
  0x4a   :  { %632 = vmatpush.msrb.mxu3 %v99_v43 }
  0x4b   :  { %173 = vmatmul.f32.gmra.mxu0 %v63_v55  ;;  %286 = vmatmul.f32.gmra.mxu1 %v63_v55 }
  0x4c   :  { %633 = vmatpush.msrb.mxu3 %v96_v48  ;;  %v80_v48 = vld [vmem:[#allocation2 + $0xa0] sm:$0xff] }
  0x4e   :  { %634 = vmatpush.msrb.mxu3 %v93_v49 }
  0x4f   :  { %248 = vmatmul.f32.gmra.mxu3 %v905_v56  ;;  %402 = vmatmul.f32.gmra.mxu2 %v64_v57 }
  0x50   :  { %635 = vmatpush.msra.mxu3 %v801_v1  ;;  %v69_v1 = vld [vmem:[#allocation2 + $0x48] sm:$0xff] }
  0x52   :  { %636 = vmatpush.msra.mxu3 %v804_v3  ;;  %v71_v3 = vld [vmem:[#allocation2 + $0x58] sm:$0xff] }
  0x53   :  { %176 = vmatmul.f32.gmra.mxu0 %v64_v57  ;;  %289 = vmatmul.f32.gmra.mxu1 %v64_v57 }
  0x54   :  { %637 = vmatpush.msra.mxu3 %v806_v5  ;;  %v73_v5 = vld [vmem:[#allocation2 + $0x68] sm:$0xff] }
  0x56   :  { %638 = vmatpush.msra.mxu3 %v814_v9  ;;  %v76_v9 = vld [vmem:[#allocation2 + $0x80] sm:$0xff] }
  0x57   :  { %251 = vmatmul.f32.gmra.mxu3 %v910_v58  ;;  %405 = vmatmul.f32.gmra.mxu2 %v65_v59 }
  0x58   :  { %639 = vmatpush.msra.mxu3 %v820_v12  ;;  %v946_v12 = vperm.slane %v140_v8, 2 }
  0x5a   :  { %640 = vmatpush.msra.mxu3 %v826_v15 }
  0x5b   :  { %179 = vmatmul.f32.gmra.mxu0 %v65_v59  ;;  %292 = vmatmul.f32.gmra.mxu1 %v65_v59  ;;  %v81_v59 = vld [vmem:[#allocation2 + $0xa8] sm:$0xff] }
  0x5c   :  { %641 = vmatpush.msra.mxu3 %v832_v18 }
  0x5e   :  { %642 = vmatpush.msra.mxu3 %v838_v21  ;;  %v77_v21 = vld [vmem:[#allocation2 + $0x88] sm:$0xff] }
  0x5f   :  { %254 = vmatmul.f32.gmra.mxu3 %v917_v60  ;;  %408 = vmatmul.f32.gmra.mxu2 %v66_v61 }
  0x60   :  { %643 = vmatpush.msra.mxu3 %v844_v24 }
  0x62   :  { %644 = vmatpush.msra.mxu3 %v850_v27 }
  0x63   :  { %182 = vmatmul.f32.gmra.mxu0 %v66_v61  ;;  %295 = vmatmul.f32.gmra.mxu1 %v66_v61 }
  0x64   :  { %645 = vmatpush.msra.mxu3 %v856_v30  ;;  %v78_v30 = vld [vmem:[#allocation2 + $0x90] sm:$0xff] }
  0x66   :  { %646 = vmatpush.msra.mxu3 %v862_v33 }
  0x67   :  { %257 = vmatmul.f32.gmra.mxu3 %v924_v62  ;;  %411 = vmatmul.f32.gmra.mxu2 %v67_v63 }
  0x68   :  { %647 = vmatpush.msra.mxu3 %v868_v36 }
  0x6a   :  { %648 = vmatpush.msra.mxu3 %v872_v39  ;;  %v79_v39 = vld [vmem:[#allocation2 + $0x98] sm:$0xff] }
  0x6b   :  { %185 = vmatmul.f32.gmra.mxu0 %v67_v63  ;;  %298 = vmatmul.f32.gmra.mxu1 %v67_v63 }
  0x6c   :  { %649 = vmatpush.msra.mxu3 %v875_v42 }
  0x6e   :  { %650 = vmatpush.msra.mxu3 %v878_v45 }
  0x6f   :  { %349 = vmatmul.f32.vlgmr.msrb.gmra.mxu3 %v881_v46  ;;  %414 = vmatmul.f32.gmra.mxu2 %v68_v0 }
  0x73   :  { %188 = vmatmul.f32.gmra.mxu0 %v68_v0  ;;  %301 = vmatmul.f32.gmra.mxu1 %v68_v0 }
  0x77   :  { %352 = vmatmul.f32.gmra.mxu3 %v887_v50  ;;  %417 = vmatmul.f32.gmra.mxu2 %v69_v1 }
  0x7b   :  { %191 = vmatmul.f32.gmra.mxu0 %v69_v1  ;;  %304 = vmatmul.f32.gmra.mxu1 %v69_v1 }
  0x7f   :  { %355 = vmatmul.f32.gmra.mxu3 %v894_v52  ;;  %420 = vmatmul.f32.gmra.mxu2 %v70_v2 }
  0x83   :  { %194 = vmatmul.f32.gmra.mxu0 %v70_v2  ;;  %307 = vmatmul.f32.gmra.mxu1 %v70_v2 }
  0x87   :  { %358 = vmatmul.f32.gmra.mxu3 %v901_v54  ;;  %423 = vmatmul.f32.gmra.mxu2 %v71_v3 }
  0x8b   :  { %197 = vmatmul.f32.gmra.mxu0 %v71_v3  ;;  %310 = vmatmul.f32.gmra.mxu1 %v71_v3 }
  0x8f   :  { %361 = vmatmul.f32.gmra.mxu3 %v905_v56  ;;  %426 = vmatmul.f32.gmra.mxu2 %v72_v4 }
  0x93   :  { %200 = vmatmul.f32.gmra.mxu0 %v72_v4  ;;  %313 = vmatmul.f32.gmra.mxu1 %v72_v4 }
  0x97   :  { %364 = vmatmul.f32.gmra.mxu3 %v910_v58  ;;  %429 = vmatmul.f32.gmra.mxu2 %v73_v5 }
  0x9b   :  { %203 = vmatmul.f32.gmra.mxu0 %v73_v5  ;;  %316 = vmatmul.f32.gmra.mxu1 %v73_v5  ;;  %v82_v5 = vld [vmem:[#allocation2 + $0xb0] sm:$0xff] }
  0x9f   :  { %367 = vmatmul.f32.gmra.mxu3 %v917_v60  ;;  %432 = vmatmul.f32.gmra.mxu2 %v74_v6 }
  0xa3   :  { %206 = vmatmul.f32.gmra.mxu0 %v74_v6  ;;  %319 = vmatmul.f32.gmra.mxu1 %v74_v6 }
  0xa7   :  { %370 = vmatmul.f32.gmra.mxu3 %v924_v62  ;;  %435 = vmatmul.f32.gmra.mxu2 %v75_v7 }
  0xab   :  { %209 = vmatmul.f32.gmra.mxu0 %v75_v7  ;;  %322 = vmatmul.f32.gmra.mxu1 %v75_v7 }
  0xaf   :  { %438 = vmatmul.f32.gmra.mxu2 %v76_v9  ;;  %462 = vmatmul.f32.vlgmr.msra.gmra.mxu3 %v881_v46 }
  0xb0   :  { %v165_v13 = vpop.f32.mrf.mxu0  ;;  %v278_v14 = vpop.f32.mrf.mxu1 }
  0xb1   :  { %v166_v15 = vadd.f32 %v165_v13, %v941_v10  ;;  %v279_v16 = vadd.f32 %v278_v14, %v943_v11 }
  0xb2   :  { %v237_v17 = vpop.f32.mrf.mxu3  ;;  %v391_v18 = vpop.f32.mrf.mxu2 }
  0xb3   :  { %487 = vst [vmem:[#allocation8] sm:$0xff] %v166_v15  ;;  %v238_v19 = vadd.f32 %v237_v17, %v941_v10  ;;  %v392_v20 = vadd.f32 %v391_v18, %v946_v12  ;;  %212 = vmatmul.f32.gmra.mxu0 %v76_v9  ;;  %325 = vmatmul.f32.gmra.mxu1 %v76_v9 }
  0xb4   :  { %488 = vst [vmem:[#allocation8 + $0x8] sm:$0xff] %v279_v16  ;;  %v83_v16 = vld [vmem:[#allocation2 + $0xb8] sm:$0xff] }
  0xb5   :  { %559 = vst [vmem:[#allocation8 + $0x240] sm:$0xff] %v238_v19 }
  0xb6   :  { %489 = vst [vmem:[#allocation8 + $0x10] sm:$0xff] %v392_v20 }
  0xb7   :  { %441 = vmatmul.f32.gmra.mxu2 %v77_v21  ;;  %465 = vmatmul.f32.gmra.mxu3 %v887_v50 }
  0xb8   :  { %v168_v22 = vpop.f32.mrf.mxu0  ;;  %v281_v23 = vpop.f32.mrf.mxu1 }
  0xb9   :  { %v169_v24 = vadd.f32 %v168_v22, %v941_v10  ;;  %v282_v25 = vadd.f32 %v281_v23, %v943_v11 }
  0xba   :  { %v240_v26 = vpop.f32.mrf.mxu3  ;;  %v394_v27 = vpop.f32.mrf.mxu2 }
  0xbb   :  { %490 = vst [vmem:[#allocation8 + $0x18] sm:$0xff] %v169_v24  ;;  %v241_v28 = vadd.f32 %v240_v26, %v941_v10  ;;  %v395_v29 = vadd.f32 %v394_v27, %v946_v12  ;;  %215 = vmatmul.f32.gmra.mxu0 %v77_v21  ;;  %328 = vmatmul.f32.gmra.mxu1 %v77_v21 }
  0xbc   :  { %491 = vst [vmem:[#allocation8 + $0x20] sm:$0xff] %v282_v25 }
  0xbd   :  { %562 = vst [vmem:[#allocation8 + $0x258] sm:$0xff] %v241_v28 }
  0xbe   :  { %492 = vst [vmem:[#allocation8 + $0x28] sm:$0xff] %v395_v29 }
  0xbf   :  { %444 = vmatmul.f32.gmra.mxu2 %v78_v30  ;;  %468 = vmatmul.f32.gmra.mxu3 %v894_v52 }
  0xc0   :  { %v171_v31 = vpop.f32.mrf.mxu0  ;;  %v284_v32 = vpop.f32.mrf.mxu1 }
  0xc1   :  { %v172_v33 = vadd.f32 %v171_v31, %v941_v10  ;;  %v285_v34 = vadd.f32 %v284_v32, %v943_v11 }
  0xc2   :  { %v243_v35 = vpop.f32.mrf.mxu3  ;;  %v397_v36 = vpop.f32.mrf.mxu2 }
  0xc3   :  { %493 = vst [vmem:[#allocation8 + $0x30] sm:$0xff] %v172_v33  ;;  %v244_v37 = vadd.f32 %v243_v35, %v941_v10  ;;  %v398_v38 = vadd.f32 %v397_v36, %v946_v12  ;;  %218 = vmatmul.f32.gmra.mxu0 %v78_v30  ;;  %331 = vmatmul.f32.gmra.mxu1 %v78_v30 }
  0xc4   :  { %494 = vst [vmem:[#allocation8 + $0x38] sm:$0xff] %v285_v34 }
  0xc5   :  { %565 = vst [vmem:[#allocation8 + $0x270] sm:$0xff] %v244_v37 }
  0xc6   :  { %495 = vst [vmem:[#allocation8 + $0x40] sm:$0xff] %v398_v38 }
  0xc7   :  { %447 = vmatmul.f32.gmra.mxu2 %v79_v39  ;;  %471 = vmatmul.f32.gmra.mxu3 %v901_v54 }
  0xc8   :  { %v174_v40 = vpop.f32.mrf.mxu0  ;;  %v287_v41 = vpop.f32.mrf.mxu1 }
  0xc9   :  { %v175_v42 = vadd.f32 %v174_v40, %v941_v10  ;;  %v288_v43 = vadd.f32 %v287_v41, %v943_v11 }
  0xca   :  { %v246_v44 = vpop.f32.mrf.mxu3  ;;  %v400_v45 = vpop.f32.mrf.mxu2 }
  0xcb   :  { %496 = vst [vmem:[#allocation8 + $0x48] sm:$0xff] %v175_v42  ;;  %v247_v46 = vadd.f32 %v246_v44, %v941_v10  ;;  %v401_v47 = vadd.f32 %v400_v45, %v946_v12  ;;  %221 = vmatmul.f32.gmra.mxu0 %v79_v39  ;;  %334 = vmatmul.f32.gmra.mxu1 %v79_v39 }
  0xcc   :  { %497 = vst [vmem:[#allocation8 + $0x50] sm:$0xff] %v288_v43 }
  0xcd   :  { %568 = vst [vmem:[#allocation8 + $0x288] sm:$0xff] %v247_v46 }
  0xce   :  { %498 = vst [vmem:[#allocation8 + $0x58] sm:$0xff] %v401_v47 }
  0xcf   :  { %450 = vmatmul.f32.gmra.mxu2 %v80_v48  ;;  %474 = vmatmul.f32.gmra.mxu3 %v905_v56 }
  0xd0   :  { %v177_v49 = vpop.f32.mrf.mxu0  ;;  %v290_v50 = vpop.f32.mrf.mxu1 }
  0xd1   :  { %v178_v51 = vadd.f32 %v177_v49, %v941_v10  ;;  %v291_v52 = vadd.f32 %v290_v50, %v943_v11 }
  0xd2   :  { %v249_v53 = vpop.f32.mrf.mxu3  ;;  %v403_v54 = vpop.f32.mrf.mxu2 }
  0xd3   :  { %499 = vst [vmem:[#allocation8 + $0x60] sm:$0xff] %v178_v51  ;;  %v250_v55 = vadd.f32 %v249_v53, %v941_v10  ;;  %v404_v57 = vadd.f32 %v403_v54, %v946_v12  ;;  %224 = vmatmul.f32.gmra.mxu0 %v80_v48  ;;  %337 = vmatmul.f32.gmra.mxu1 %v80_v48 }
  0xd4   :  { %500 = vst [vmem:[#allocation8 + $0x68] sm:$0xff] %v291_v52 }
  0xd5   :  { %571 = vst [vmem:[#allocation8 + $0x2a0] sm:$0xff] %v250_v55 }
  0xd6   :  { %501 = vst [vmem:[#allocation8 + $0x70] sm:$0xff] %v404_v57 }
  0xd7   :  { %453 = vmatmul.f32.gmra.mxu2 %v81_v59  ;;  %477 = vmatmul.f32.gmra.mxu3 %v910_v58 }
  0xd8   :  { %v180_v56 = vpop.f32.mrf.mxu0  ;;  %v293_v61 = vpop.f32.mrf.mxu1 }
  0xd9   :  { %v181_v63 = vadd.f32 %v180_v56, %v941_v10  ;;  %v294_v0 = vadd.f32 %v293_v61, %v943_v11 }
  0xda   :  { %v252_v1 = vpop.f32.mrf.mxu3  ;;  %v406_v2 = vpop.f32.mrf.mxu2 }
  0xdb   :  { %502 = vst [vmem:[#allocation8 + $0x78] sm:$0xff] %v181_v63  ;;  %v253_v3 = vadd.f32 %v252_v1, %v941_v10  ;;  %v407_v4 = vadd.f32 %v406_v2, %v946_v12  ;;  %227 = vmatmul.f32.gmra.mxu0 %v81_v59  ;;  %340 = vmatmul.f32.gmra.mxu1 %v81_v59 }
  0xdc   :  { %503 = vst [vmem:[#allocation8 + $0x80] sm:$0xff] %v294_v0 }
  0xdd   :  { %574 = vst [vmem:[#allocation8 + $0x2b8] sm:$0xff] %v253_v3 }
  0xde   :  { %504 = vst [vmem:[#allocation8 + $0x88] sm:$0xff] %v407_v4 }
  0xdf   :  { %456 = vmatmul.f32.gmra.mxu2 %v82_v5  ;;  %480 = vmatmul.f32.gmra.mxu3 %v917_v60 }
  0xe0   :  { %v183_v58 = vpop.f32.mrf.mxu0  ;;  %v296_v6 = vpop.f32.mrf.mxu1 }
  0xe1   :  { %v184_v7 = vadd.f32 %v183_v58, %v941_v10  ;;  %v297_v8 = vadd.f32 %v296_v6, %v943_v11 }
  0xe2   :  { %v255_v9 = vpop.f32.mrf.mxu3  ;;  %v409_v13 = vpop.f32.mrf.mxu2 }
  0xe3   :  { %505 = vst [vmem:[#allocation8 + $0x90] sm:$0xff] %v184_v7  ;;  %v256_v14 = vadd.f32 %v255_v9, %v941_v10  ;;  %v410_v15 = vadd.f32 %v409_v13, %v946_v12  ;;  %230 = vmatmul.f32.gmra.mxu0 %v82_v5  ;;  %343 = vmatmul.f32.gmra.mxu1 %v82_v5 }
  0xe4   :  { %506 = vst [vmem:[#allocation8 + $0x98] sm:$0xff] %v297_v8 }
  0xe5   :  { %577 = vst [vmem:[#allocation8 + $0x2d0] sm:$0xff] %v256_v14 }
  0xe6   :  { %507 = vst [vmem:[#allocation8 + $0xa0] sm:$0xff] %v410_v15 }
  0xe7   :  { %459 = vmatmul.f32.gmra.mxu2 %v83_v16  ;;  %483 = vmatmul.f32.gmra.mxu3 %v924_v62 }
  0xe8   :  { %v186_v60 = vpop.f32.mrf.mxu0  ;;  %v299_v17 = vpop.f32.mrf.mxu1 }
  0xe9   :  { %v187_v18 = vadd.f32 %v186_v60, %v941_v10  ;;  %v300_v19 = vadd.f32 %v299_v17, %v943_v11 }
  0xea   :  { %v258_v20 = vpop.f32.mrf.mxu3  ;;  %v412_v21 = vpop.f32.mrf.mxu2 }
  0xeb   :  { %508 = vst [vmem:[#allocation8 + $0xa8] sm:$0xff] %v187_v18  ;;  %v259_v22 = vadd.f32 %v258_v20, %v941_v10  ;;  %v413_v23 = vadd.f32 %v412_v21, %v946_v12  ;;  %233 = vmatmul.f32.gmra.mxu0 %v83_v16  ;;  %346 = vmatmul.f32.gmra.mxu1 %v83_v16 }
  0xec   :  { %509 = vst [vmem:[#allocation8 + $0xb0] sm:$0xff] %v300_v19 }
  0xed   :  { %580 = vst [vmem:[#allocation8 + $0x2e8] sm:$0xff] %v259_v22 }
  0xee   :  { %510 = vst [vmem:[#allocation8 + $0xb8] sm:$0xff] %v413_v23 }
  0xf0   :  { %v189_v24 = vpop.f32.mrf.mxu0  ;;  %v302_v62 = vpop.f32.mrf.mxu1 }
  0xf1   :  { %v190_v25 = vadd.f32 %v189_v24, %v941_v10  ;;  %v303_v26 = vadd.f32 %v302_v62, %v943_v11 }
  0xf2   :  { %v350_v27 = vpop.f32.mrf.mxu3  ;;  %v415_v28 = vpop.f32.mrf.mxu2 }
  0xf3   :  { %511 = vst [vmem:[#allocation8 + $0xc0] sm:$0xff] %v190_v25  ;;  %v351_v29 = vadd.f32 %v350_v27, %v943_v11  ;;  %v416_v30 = vadd.f32 %v415_v28, %v946_v12 }
  0xf4   :  { %512 = vst [vmem:[#allocation8 + $0xc8] sm:$0xff] %v303_v26 }
  0xf5   :  { %560 = vst [vmem:[#allocation8 + $0x248] sm:$0xff] %v351_v29 }
  0xf6   :  { %513 = vst [vmem:[#allocation8 + $0xd0] sm:$0xff] %v416_v30 }
  0xf8   :  { %v192_v31 = vpop.f32.mrf.mxu0  ;;  %v305_v32 = vpop.f32.mrf.mxu1 }
  0xf9   :  { %v193_v33 = vadd.f32 %v192_v31, %v941_v10  ;;  %v306_v34 = vadd.f32 %v305_v32, %v943_v11 }
  0xfa   :  { %v353_v35 = vpop.f32.mrf.mxu3  ;;  %v418_v36 = vpop.f32.mrf.mxu2 }
  0xfb   :  { %514 = vst [vmem:[#allocation8 + $0xd8] sm:$0xff] %v193_v33  ;;  %v354_v37 = vadd.f32 %v353_v35, %v943_v11  ;;  %v419_v38 = vadd.f32 %v418_v36, %v946_v12 }
  0xfc   :  { %515 = vst [vmem:[#allocation8 + $0xe0] sm:$0xff] %v306_v34 }
  0xfd   :  { %563 = vst [vmem:[#allocation8 + $0x260] sm:$0xff] %v354_v37 }
  0xfe   :  { %516 = vst [vmem:[#allocation8 + $0xe8] sm:$0xff] %v419_v38 }
 0x100   :  { %v195_v39 = vpop.f32.mrf.mxu0  ;;  %v308_v40 = vpop.f32.mrf.mxu1 }
 0x101   :  { %v196_v41 = vadd.f32 %v195_v39, %v941_v10  ;;  %v309_v42 = vadd.f32 %v308_v40, %v943_v11 }
 0x102   :  { %v356_v43 = vpop.f32.mrf.mxu3  ;;  %v421_v44 = vpop.f32.mrf.mxu2 }
 0x103   :  { %517 = vst [vmem:[#allocation8 + $0xf0] sm:$0xff] %v196_v41  ;;  %v357_v45 = vadd.f32 %v356_v43, %v943_v11  ;;  %v422_v46 = vadd.f32 %v421_v44, %v946_v12 }
 0x104   :  { %518 = vst [vmem:[#allocation8 + $0xf8] sm:$0xff] %v309_v42 }
 0x105   :  { %566 = vst [vmem:[#allocation8 + $0x278] sm:$0xff] %v357_v45 }
 0x106   :  { %519 = vst [vmem:[#allocation8 + $0x100] sm:$0xff] %v422_v46 }
 0x108   :  { %v198_v47 = vpop.f32.mrf.mxu0  ;;  %v311_v48 = vpop.f32.mrf.mxu1 }
 0x109   :  { %v199_v49 = vadd.f32 %v198_v47, %v941_v10  ;;  %v312_v50 = vadd.f32 %v311_v48, %v943_v11 }
 0x10a   :  { %v359_v51 = vpop.f32.mrf.mxu3  ;;  %v424_v52 = vpop.f32.mrf.mxu2 }
 0x10b   :  { %520 = vst [vmem:[#allocation8 + $0x108] sm:$0xff] %v199_v49  ;;  %v360_v53 = vadd.f32 %v359_v51, %v943_v11  ;;  %v425_v54 = vadd.f32 %v424_v52, %v946_v12 }
 0x10c   :  { %521 = vst [vmem:[#allocation8 + $0x110] sm:$0xff] %v312_v50 }
 0x10d   :  { %569 = vst [vmem:[#allocation8 + $0x290] sm:$0xff] %v360_v53 }
 0x10e   :  { %522 = vst [vmem:[#allocation8 + $0x118] sm:$0xff] %v425_v54 }
 0x110   :  { %v201_v55 = vpop.f32.mrf.mxu0  ;;  %v314_v57 = vpop.f32.mrf.mxu1 }
 0x111   :  { %v202_v59 = vadd.f32 %v201_v55, %v941_v10  ;;  %v315_v56 = vadd.f32 %v314_v57, %v943_v11 }
 0x112   :  { %v362_v61 = vpop.f32.mrf.mxu3  ;;  %v427_v63 = vpop.f32.mrf.mxu2 }
 0x113   :  { %523 = vst [vmem:[#allocation8 + $0x120] sm:$0xff] %v202_v59  ;;  %v363_v0 = vadd.f32 %v362_v61, %v943_v11  ;;  %v428_v1 = vadd.f32 %v427_v63, %v946_v12 }
 0x114   :  { %524 = vst [vmem:[#allocation8 + $0x128] sm:$0xff] %v315_v56 }
 0x115   :  { %572 = vst [vmem:[#allocation8 + $0x2a8] sm:$0xff] %v363_v0 }
 0x116   :  { %525 = vst [vmem:[#allocation8 + $0x130] sm:$0xff] %v428_v1 }
 0x118   :  { %v204_v2 = vpop.f32.mrf.mxu0  ;;  %v317_v3 = vpop.f32.mrf.mxu1 }
 0x119   :  { %v205_v4 = vadd.f32 %v204_v2, %v941_v10  ;;  %v318_v5 = vadd.f32 %v317_v3, %v943_v11 }
 0x11a   :  { %v365_v58 = vpop.f32.mrf.mxu3  ;;  %v430_v6 = vpop.f32.mrf.mxu2 }
 0x11b   :  { %526 = vst [vmem:[#allocation8 + $0x138] sm:$0xff] %v205_v4  ;;  %v366_v7 = vadd.f32 %v365_v58, %v943_v11  ;;  %v431_v8 = vadd.f32 %v430_v6, %v946_v12 }
 0x11c   :  { %527 = vst [vmem:[#allocation8 + $0x140] sm:$0xff] %v318_v5 }
 0x11d   :  { %575 = vst [vmem:[#allocation8 + $0x2c0] sm:$0xff] %v366_v7 }
 0x11e   :  { %528 = vst [vmem:[#allocation8 + $0x148] sm:$0xff] %v431_v8 }
 0x120   :  { %v207_v9 = vpop.f32.mrf.mxu0  ;;  %v320_v13 = vpop.f32.mrf.mxu1 }
 0x121   :  { %v208_v14 = vadd.f32 %v207_v9, %v941_v10  ;;  %v321_v15 = vadd.f32 %v320_v13, %v943_v11 }
 0x122   :  { %v368_v16 = vpop.f32.mrf.mxu3  ;;  %v433_v60 = vpop.f32.mrf.mxu2 }
 0x123   :  { %529 = vst [vmem:[#allocation8 + $0x150] sm:$0xff] %v208_v14  ;;  %v369_v17 = vadd.f32 %v368_v16, %v943_v11  ;;  %v434_v18 = vadd.f32 %v433_v60, %v946_v12 }
 0x124   :  { %530 = vst [vmem:[#allocation8 + $0x158] sm:$0xff] %v321_v15 }
 0x125   :  { %578 = vst [vmem:[#allocation8 + $0x2d8] sm:$0xff] %v369_v17 }
 0x126   :  { %531 = vst [vmem:[#allocation8 + $0x160] sm:$0xff] %v434_v18 }
 0x128   :  { %v210_v19 = vpop.f32.mrf.mxu0  ;;  %v323_v20 = vpop.f32.mrf.mxu1 }
 0x129   :  { %v211_v21 = vadd.f32 %v210_v19, %v941_v10  ;;  %v324_v22 = vadd.f32 %v323_v20, %v943_v11 }
 0x12a   :  { %v371_v23 = vpop.f32.mrf.mxu3  ;;  %v436_v24 = vpop.f32.mrf.mxu2 }
 0x12b   :  { %532 = vst [vmem:[#allocation8 + $0x168] sm:$0xff] %v211_v21  ;;  %v372_v62 = vadd.f32 %v371_v23, %v943_v11  ;;  %v437_v25 = vadd.f32 %v436_v24, %v946_v12 }
 0x12c   :  { %533 = vst [vmem:[#allocation8 + $0x170] sm:$0xff] %v324_v22 }
 0x12d   :  { %581 = vst [vmem:[#allocation8 + $0x2f0] sm:$0xff] %v372_v62 }
 0x12e   :  { %534 = vst [vmem:[#allocation8 + $0x178] sm:$0xff] %v437_v25 }
 0x130   :  { %v213_v26 = vpop.f32.mrf.mxu0  ;;  %v326_v27 = vpop.f32.mrf.mxu1 }
 0x131   :  { %v214_v28 = vadd.f32 %v213_v26, %v941_v10  ;;  %v327_v29 = vadd.f32 %v326_v27, %v943_v11 }
 0x132   :  { %v439_v30 = vpop.f32.mrf.mxu2  ;;  %v463_v31 = vpop.f32.mrf.mxu3 }
 0x133   :  { %535 = vst [vmem:[#allocation8 + $0x180] sm:$0xff] %v214_v28  ;;  %v440_v32 = vadd.f32 %v439_v30, %v946_v12  ;;  %v464_v33 = vadd.f32 %v463_v31, %v946_v12 }
 0x134   :  { %536 = vst [vmem:[#allocation8 + $0x188] sm:$0xff] %v327_v29 }
 0x135   :  { %537 = vst [vmem:[#allocation8 + $0x190] sm:$0xff] %v440_v32 }
 0x136   :  { %561 = vst [vmem:[#allocation8 + $0x250] sm:$0xff] %v464_v33 }
 0x138   :  { %v216_v34 = vpop.f32.mrf.mxu0  ;;  %v329_v35 = vpop.f32.mrf.mxu1 }
 0x139   :  { %v217_v36 = vadd.f32 %v216_v34, %v941_v10  ;;  %v330_v37 = vadd.f32 %v329_v35, %v943_v11 }
 0x13a   :  { %v442_v38 = vpop.f32.mrf.mxu2  ;;  %v466_v39 = vpop.f32.mrf.mxu3 }
 0x13b   :  { %538 = vst [vmem:[#allocation8 + $0x198] sm:$0xff] %v217_v36  ;;  %v443_v40 = vadd.f32 %v442_v38, %v946_v12  ;;  %v467_v41 = vadd.f32 %v466_v39, %v946_v12 }
 0x13c   :  { %539 = vst [vmem:[#allocation8 + $0x1a0] sm:$0xff] %v330_v37 }
 0x13d   :  { %540 = vst [vmem:[#allocation8 + $0x1a8] sm:$0xff] %v443_v40 }
 0x13e   :  { %564 = vst [vmem:[#allocation8 + $0x268] sm:$0xff] %v467_v41 }
 0x140   :  { %v219_v42 = vpop.f32.mrf.mxu0  ;;  %v332_v43 = vpop.f32.mrf.mxu1 }
 0x141   :  { %v220_v44 = vadd.f32 %v219_v42, %v941_v10  ;;  %v333_v45 = vadd.f32 %v332_v43, %v943_v11 }
 0x142   :  { %v445_v46 = vpop.f32.mrf.mxu2  ;;  %v469_v47 = vpop.f32.mrf.mxu3 }
 0x143   :  { %541 = vst [vmem:[#allocation8 + $0x1b0] sm:$0xff] %v220_v44  ;;  %v446_v48 = vadd.f32 %v445_v46, %v946_v12  ;;  %v470_v49 = vadd.f32 %v469_v47, %v946_v12 }
 0x144   :  { %542 = vst [vmem:[#allocation8 + $0x1b8] sm:$0xff] %v333_v45 }
 0x145   :  { %543 = vst [vmem:[#allocation8 + $0x1c0] sm:$0xff] %v446_v48 }
 0x146   :  { %567 = vst [vmem:[#allocation8 + $0x280] sm:$0xff] %v470_v49 }
 0x148   :  { %v222_v50 = vpop.f32.mrf.mxu0  ;;  %v335_v51 = vpop.f32.mrf.mxu1 }
 0x149   :  { %v223_v52 = vadd.f32 %v222_v50, %v941_v10  ;;  %v336_v53 = vadd.f32 %v335_v51, %v943_v11 }
 0x14a   :  { %v448_v54 = vpop.f32.mrf.mxu2  ;;  %v472_v55 = vpop.f32.mrf.mxu3 }
 0x14b   :  { %544 = vst [vmem:[#allocation8 + $0x1c8] sm:$0xff] %v223_v52  ;;  %v449_v57 = vadd.f32 %v448_v54, %v946_v12  ;;  %v473_v59 = vadd.f32 %v472_v55, %v946_v12 }
 0x14c   :  { %545 = vst [vmem:[#allocation8 + $0x1d0] sm:$0xff] %v336_v53 }
 0x14d   :  { %546 = vst [vmem:[#allocation8 + $0x1d8] sm:$0xff] %v449_v57 }
 0x14e   :  { %570 = vst [vmem:[#allocation8 + $0x298] sm:$0xff] %v473_v59 }
 0x150   :  { %v225_v56 = vpop.f32.mrf.mxu0  ;;  %v338_v61 = vpop.f32.mrf.mxu1 }
 0x151   :  { %v226_v63 = vadd.f32 %v225_v56, %v941_v10  ;;  %v339_v0 = vadd.f32 %v338_v61, %v943_v11 }
 0x152   :  { %v451_v1 = vpop.f32.mrf.mxu2  ;;  %v475_v2 = vpop.f32.mrf.mxu3 }
 0x153   :  { %547 = vst [vmem:[#allocation8 + $0x1e0] sm:$0xff] %v226_v63  ;;  %v452_v3 = vadd.f32 %v451_v1, %v946_v12  ;;  %v476_v4 = vadd.f32 %v475_v2, %v946_v12 }
 0x154   :  { %548 = vst [vmem:[#allocation8 + $0x1e8] sm:$0xff] %v339_v0 }
 0x155   :  { %549 = vst [vmem:[#allocation8 + $0x1f0] sm:$0xff] %v452_v3 }
 0x156   :  { %573 = vst [vmem:[#allocation8 + $0x2b0] sm:$0xff] %v476_v4 }
 0x158   :  { %v228_v5 = vpop.f32.mrf.mxu0  ;;  %v341_v58 = vpop.f32.mrf.mxu1 }
 0x159   :  { %v229_v6 = vadd.f32 %v228_v5, %v941_v10  ;;  %v342_v7 = vadd.f32 %v341_v58, %v943_v11 }
 0x15a   :  { %v454_v8 = vpop.f32.mrf.mxu2  ;;  %v478_v9 = vpop.f32.mrf.mxu3 }
 0x15b   :  { %550 = vst [vmem:[#allocation8 + $0x1f8] sm:$0xff] %v229_v6  ;;  %v455_v13 = vadd.f32 %v454_v8, %v946_v12  ;;  %v479_v14 = vadd.f32 %v478_v9, %v946_v12 }
 0x15c   :  { %551 = vst [vmem:[#allocation8 + $0x200] sm:$0xff] %v342_v7 }
 0x15d   :  { %552 = vst [vmem:[#allocation8 + $0x208] sm:$0xff] %v455_v13 }
 0x15e   :  { %576 = vst [vmem:[#allocation8 + $0x2c8] sm:$0xff] %v479_v14 }
 0x160   :  { %v231_v15 = vpop.f32.mrf.mxu0  ;;  %v344_v16 = vpop.f32.mrf.mxu1 }
 0x161   :  { %v232_v60 = vadd.f32 %v231_v15, %v941_v10  ;;  %v345_v17 = vadd.f32 %v344_v16, %v943_v11 }
 0x162   :  { %v457_v18 = vpop.f32.mrf.mxu2  ;;  %v481_v19 = vpop.f32.mrf.mxu3 }
 0x163   :  { %553 = vst [vmem:[#allocation8 + $0x210] sm:$0xff] %v232_v60  ;;  %v458_v20 = vadd.f32 %v457_v18, %v946_v12  ;;  %v482_v21 = vadd.f32 %v481_v19, %v946_v12 }
 0x164   :  { %554 = vst [vmem:[#allocation8 + $0x218] sm:$0xff] %v345_v17 }
 0x165   :  { %555 = vst [vmem:[#allocation8 + $0x220] sm:$0xff] %v458_v20 }
 0x166   :  { %579 = vst [vmem:[#allocation8 + $0x2e0] sm:$0xff] %v482_v21 }
 0x168   :  { %v234_v22 = vpop.f32.mrf.mxu0  ;;  %v347_v23 = vpop.f32.mrf.mxu1 }
 0x169   :  { %v235_v24 = vadd.f32 %v234_v22, %v941_v10  ;;  %v348_v62 = vadd.f32 %v347_v23, %v943_v11 }
 0x16a   :  { %v460_v25 = vpop.f32.mrf.mxu2  ;;  %v484_v26 = vpop.f32.mrf.mxu3 }
 0x16b   :  { %556 = vst [vmem:[#allocation8 + $0x228] sm:$0xff] %v235_v24  ;;  %v461_v27 = vadd.f32 %v460_v25, %v946_v12  ;;  %v485_v28 = vadd.f32 %v484_v26, %v946_v12 }
 0x16c   :  { %557 = vst [vmem:[#allocation8 + $0x230] sm:$0xff] %v348_v62 }
 0x16d   :  { %558 = vst [vmem:[#allocation8 + $0x238] sm:$0xff] %v461_v27 }
 0x16e   :  { %582 = vst [vmem:[#allocation8 + $0x2f8] sm:$0xff] %v485_v28 }
 0x16f   :  { %595 = dma.vmem_to_hbm [thread:$0]  %s588_s29, 12288, %s590_s5, [#allocation4], %s762_s20, %s762_s20, %s763_s21  }
 0x170   :  { %759 = dma.done.wait [#allocation4], 12288  }
 0x171   :  { %760 = vsyncadd [#allocation4], 4294955008 }
 0x172   :  { %600 = vsyncpa [#allocation3], 1 }
 0x173   :  { %601 = vsyncpa [#allocation6], 1 }
 0x174   :  { %602 = vsyncpa [#allocation4], 1 }

</bundles_post_ra>
